<compile_context>
chip_gen: v6e
topology: v6e:2x2x1
jax: 0.10.0
libtpu: 0.0.40
codegen_flags: <defaults>
</compile_context>

<pallas_src>
import functools

import jax
import jax.numpy as jnp
from jax.experimental import pallas as pl
from jax.experimental.pallas import tpu as pltpu


_ELEMENTWISE_MODES = ("sum", "mean", "max")


def _agg_kernel(*refs, mode, L, n_rows):
    """One grid step: aggregate a tile of nodes across L per-layer refs + ReLU.

    refs layout:
      mode == 'att':  (x_0..x_{L-1}, w_ref(H,1), b_ref(1,1) SMEM, o_ref(tn,H))
      mode == 'cat':  (x_0..x_{L-1}, o_ref(tn, L*H))
      else:           (x_0..x_{L-1}, o_ref(tn, H))
    """
    x_refs = refs[:L]

    if mode == "att":
        w_ref, b_ref, o_ref = refs[L], refs[L + 1], refs[L + 2]
        tn = x_refs[0].shape[0]
        w = w_ref[...]                                   # (H, 1), input dtype
        b = b_ref[0, 0].astype(jnp.float32)

        # Only generate the row mask when the last block is actually partial
        # (trace-time decision); keeps garbage rows from producing inf/NaN.
        needs_mask = (n_rows % tn) != 0
        if needs_mask:
            row0 = pl.program_id(0) * tn
            rows = jax.lax.broadcasted_iota(jnp.int32, (tn, 1), 0)
            valid = (row0 + rows) < n_rows

        # Pass 1: per-row, per-layer score on the MXU: (tn,H) @ (H,1) -> (tn,1).
        # Only the tiny (tn,1) scores stay live (no L full f32 tile copies).
        scores = []
        for l in range(L):
            s = jnp.dot(x_refs[l][...], w,
                        preferred_element_type=jnp.float32) + b
            if needs_mask:
                s = jnp.where(valid, s, 0.0)
            scores.append(s)

        # Numerically-stable softmax over the (unrolled) layer axis.
        m = scores[0]
        for s in scores[1:]:
            m = jnp.maximum(m, s)
        exps = [jnp.exp(s - m) for s in scores]
        denom = exps[0]
        for e in exps[1:]:
            denom = denom + e

        # Pass 2: re-read the layer tiles (cheap VMEM re-reads, 3 vld/cycle) and
        # accumulate the softmax-weighted sum in f32.
        acc = x_refs[0][...].astype(jnp.float32) * exps[0]
        for l in range(1, L):
            acc = acc + x_refs[l][...].astype(jnp.float32) * exps[l]
        out = acc / denom                                # exact divide (mem-bound)
        o_ref[...] = jnp.maximum(out, 0.0).astype(o_ref.dtype)

    elif mode == "cat":
        o_ref = refs[L]
        H = x_refs[0].shape[-1]
        # Pure load + relu + column-slab store: no in-kernel (tn,L,H) relayout.
        for l in range(L):
            o_ref[:, l * H:(l + 1) * H] = jnp.maximum(
                x_refs[l][...], 0).astype(o_ref.dtype)

    else:
        o_ref = refs[L]
        if mode == "sum":
            acc = x_refs[0][...].astype(jnp.float32)
            for l in range(1, L):
                acc = acc + x_refs[l][...].astype(jnp.float32)
            out = acc
        elif mode == "mean":
            acc = x_refs[0][...].astype(jnp.float32)
            for l in range(1, L):
                acc = acc + x_refs[l][...].astype(jnp.float32)
            out = acc * (1.0 / L)
        elif mode == "max":                  # elementwise max is exact in any dtype
            out = x_refs[0][...]
            for l in range(1, L):
                out = jnp.maximum(out, x_refs[l][...])
        else:
            raise NotImplementedError(mode)
        o_ref[...] = jnp.maximum(out, 0).astype(o_ref.dtype)


def _default_vmem_budget():
    """Per-tile VMEM budget (bytes), generation aware."""
    try:
        cap = pltpu.get_tpu_info().vmem_capacity_bytes
    except Exception:  # pragma: no cover - query unavailable
        cap = None
    if cap is None:
        return 16 << 20
    if cap >= (100 << 20):        # v5e / v6e: 128 MiB parts -> use ~a quarter.
        return cap // 4           # ~32 MiB
    return min(cap // 4, 16 << 20)  # v7x: 64 MiB physical -> stay conservative.


def _default_dimension_semantics():
    """CORE_PARALLEL only on v7x (2 TCs/chip); plain 'parallel' elsewhere."""
    try:
        ver = getattr(pltpu.get_tpu_info(), "chip_version", None)
        name = getattr(ver, "name", "" if ver is None else str(ver))
        if "7" in name:
            return (pltpu.CORE_PARALLEL,)
    except Exception:  # pragma: no cover
        pass
    return ("parallel",)


def _pick_tile_n(n_rows, row_bytes, budget):
    """Largest node tile that fits the budget; prefer one that divides n_rows."""
    tile = budget // max(row_bytes, 1)
    if tile >= n_rows:
        return n_rows                                 # full extent: always legal
    tile = int(min(4096, max(8, (tile // 8) * 8)))
    # Prefer a nearby tile (within ~12%) that divides n_rows exactly, so the
    # last block is full (no masked writeback / garbage rows).
    lo = max(8, (int(tile * 0.88) // 8) * 8)
    for cand in range(tile, lo - 1, -8):
        if n_rows % cand == 0:
            return cand
    return tile


def la_aggregator_forward(xs, att_weight=None, att_bias=None, *, mode,
                          tile_n=None, vmem_budget_bytes=None,
                          dimension_semantics=None):
    """xs: list of [N, H] arrays (one per layer). Returns relu(aggregate(xs))."""
    if mode == "lstm":
        # TODO(synk): JumpingKnowledge('lstm') uses a bidirectional LSTM attention
        # over layers; no clean single-Pallas-kernel equivalent implemented here.
        raise NotImplementedError("lstm mode not implemented")
    if mode not in ("att", "cat") + _ELEMENTWISE_MODES:
        raise NotImplementedError(mode)

    L = len(xs)
    N, H = xs[0].shape
    dtype = xs[0].dtype
    itemsize = jnp.dtype(dtype).itemsize

    # Lane-density fold for purely elementwise modes when H is lane-sparse:
    # [N, H] -> [N*H/128, 128] is a free row-major reshape and makes every load
    # and the output store an unmasked, lane-dense vector op.
    fold = mode in _ELEMENTWISE_MODES and H < 128 and (N * H) % 128 == 0
    if fold:
        xs = [x.reshape(-1, 128) for x in xs]
    Nw, Hw = xs[0].shape
    out_cols = L * Hw if mode == "cat" else Hw

    if vmem_budget_bytes is None:
        vmem_budget_bytes = _default_vmem_budget()

    # Double-buffered per-row footprint (inputs + output) plus att-mode f32
    # working set (one cast layer + the f32 accumulator + tiny score vectors).
    row_bytes = 2 * (L * Hw + out_cols) * itemsize
    if mode == "att":
        row_bytes += 3 * Hw * 4 + 4 * L * 4

    if tile_n is None:
        tile_n = _pick_tile_n(Nw, row_bytes, vmem_budget_bytes)

    grid = (pl.cdiv(Nw, tile_n),)

    # Derive the scoped-VMEM limit from the actual footprint (+headroom) so the
    # granted VMEM and the tile size agree on every generation.
    vmem_limit = int(min(max(row_bytes * tile_n + (8 << 20), 24 << 20),
                         vmem_budget_bytes + (16 << 20)))

    kernel = functools.partial(_agg_kernel, mode=mode, L=L, n_rows=Nw)

    layer_spec = pl.BlockSpec((tile_n, Hw), lambda i: (i, 0))
    in_specs = [layer_spec] * L
    args = list(xs)
    if mode == "att":
        # Weight is passed pre-transposed as (H, 1) so the per-layer score is a
        # plain MXU matvec; bias is a single SMEM scalar.
        in_specs.append(pl.BlockSpec((H, 1), lambda i: (0, 0)))
        in_specs.append(pl.BlockSpec((1, 1), lambda i: (0, 0),
                                     memory_space=pltpu.MemorySpace.SMEM))
        args.append(att_weight.reshape(H, 1).astype(dtype))
        args.append(att_bias.reshape(1, 1).astype(jnp.float32))

    if dimension_semantics is None:
        dimension_semantics = _default_dimension_semantics()

    out = pl.pallas_call(
        kernel,
        out_shape=jax.ShapeDtypeStruct((Nw, out_cols), dtype),
        grid_spec=pltpu.PrefetchScalarGridSpec(
            num_scalar_prefetch=0,
            grid=grid,
            in_specs=in_specs,
            out_specs=pl.BlockSpec((tile_n, out_cols), lambda i: (i, 0)),
        ),
        compiler_params=pltpu.CompilerParams(
            dimension_semantics=dimension_semantics,
            vmem_limit_bytes=vmem_limit,
        ),
    )(*args)

    if fold:
        out = out.reshape(N, H)
    return out


def _reference(xs, att_weight, att_bias, mode):
    x = jnp.stack(xs, axis=-1)                             # [N, H, L]
    if mode == "att":
        inp = jnp.transpose(x, (0, 2, 1))                  # [N, L, H]
        w = inp @ att_weight.T + att_bias[None, None, :]   # [N, L, 1]
        w = jax.nn.softmax(w, axis=1)
        out = jnp.sum(jnp.transpose(inp * w, (0, 2, 1)), axis=-1)
    elif mode == "sum":
        out = jnp.sum(x, axis=-1)
    elif mode == "mean":
        out = jnp.mean(x, axis=-1)
    elif mode == "max":
        out = jnp.max(x, axis=-1)
    elif mode == "cat":
        out = jnp.concatenate(xs, axis=-1)
    return jax.nn.relu(out)


if __name__ == "__main__":
    key = jax.random.PRNGKey(0)
    N, H, L = 16, 32, 3                                    # nodes, hidden_size, num_layers

    k_x, k_w, k_b = jax.random.split(key, 3)
    xs = [jax.random.normal(jax.random.fold_in(k_x, l), (N, H), dtype=jnp.float32)
          for l in range(L)]

    # Deterministic parameter init for Linear(hidden_size, 1) used by mode='att'.
    att_weight = jax.random.normal(k_w, (1, H), dtype=jnp.float32) * 0.1
    att_bias = jax.random.normal(k_b, (1,), dtype=jnp.float32) * 0.1

    ok = True
    for mode in ("att", "sum", "mean", "max", "cat"):
        out = la_aggregator_forward(xs, att_weight, att_bias, mode=mode)
        out = jax.block_until_ready(out)
        ref = _reference(xs, att_weight, att_bias, mode)
        # 'att' scores go through the MXU (possibly reduced-precision f32 pass),
        # so use a slightly looser tolerance there.
        tol = 5e-3 if mode == "att" else 1e-5
        ok &= bool(jnp.allclose(out, ref, atol=tol, rtol=tol))

    assert ok, "Pallas output mismatched JAX reference"
    print("KERNEL_OK")
</pallas_src>

<mosaic_0001>
module attributes {stable_mosaic.version = 11 : i64} {
  func.func @_agg_kernel(%arg0: i32, %arg1: memref<16x32xf32, #tpu.memory_space<vmem>>, %arg2: memref<16x32xf32, #tpu.memory_space<vmem>>, %arg3: memref<16x32xf32, #tpu.memory_space<vmem>>, %arg4: memref<32x1xf32, #tpu.memory_space<vmem>>, %arg5: memref<1x1xf32, #tpu.memory_space<smem>>, %arg6: memref<16x32xf32, #tpu.memory_space<vmem>>) attributes {dimension_semantics = [#tpu.dimension_semantics<parallel>], iteration_bounds = array<i64: 1>, scalar_prefetch = 0 : i64, scratch_operands = 0 : i64, tpu.core_type = #tpu.core_type<tc>, window_params = [{transform_indices = @transform_0, window_bounds = array<i64: 16, 32>}, {transform_indices = @transform_1, window_bounds = array<i64: 16, 32>}, {transform_indices = @transform_2, window_bounds = array<i64: 16, 32>}, {pipeline_mode = #tpu.pipeline_mode<synchronous>, transform_indices = @transform_3, window_bounds = array<i64: 32, 1>}, {transform_indices = @transform_4, window_bounds = array<i64: 1, 1>}, {transform_indices = @transform_5, window_bounds = array<i64: 16, 32>}]} {
    %c0 = arith.constant 0 : index
    %c0_0 = arith.constant 0 : index
    %0 = vector.load %arg4[%c0, %c0_0] : memref<32x1xf32, #tpu.memory_space<vmem>>, vector<32x1xf32>
    %c0_1 = arith.constant 0 : index
    %c0_2 = arith.constant 0 : index
    %1 = memref.load %arg5[%c0_1, %c0_2] : memref<1x1xf32, #tpu.memory_space<smem>>
    %c0_3 = arith.constant 0 : index
    %c0_4 = arith.constant 0 : index
    %2 = vector.load %arg1[%c0_3, %c0_4] : memref<16x32xf32, #tpu.memory_space<vmem>>, vector<16x32xf32>
    %cst = arith.constant dense<0.000000e+00> : vector<16x1xf32>
    %3 = tpu.matmul %2, %0, %cst {dimension_numbers = #tpu.dot_dimension_numbers<[1], [0], [0], [1], [0, 0, 1, 1], [], []>} : vector<16x32xf32>, vector<32x1xf32>, vector<16x1xf32> -> vector<16x1xf32>
    %4 = vector.broadcast %1 : f32 to vector<16x1xf32>
    %5 = arith.addf %3, %4 : vector<16x1xf32>
    %c0_5 = arith.constant 0 : index
    %c0_6 = arith.constant 0 : index
    %6 = vector.load %arg2[%c0_5, %c0_6] : memref<16x32xf32, #tpu.memory_space<vmem>>, vector<16x32xf32>
    %cst_7 = arith.constant dense<0.000000e+00> : vector<16x1xf32>
    %7 = tpu.matmul %6, %0, %cst_7 {dimension_numbers = #tpu.dot_dimension_numbers<[1], [0], [0], [1], [0, 0, 1, 1], [], []>} : vector<16x32xf32>, vector<32x1xf32>, vector<16x1xf32> -> vector<16x1xf32>
    %8 = vector.broadcast %1 : f32 to vector<16x1xf32>
    %9 = arith.addf %7, %8 : vector<16x1xf32>
    %c0_8 = arith.constant 0 : index
    %c0_9 = arith.constant 0 : index
    %10 = vector.load %arg3[%c0_8, %c0_9] : memref<16x32xf32, #tpu.memory_space<vmem>>, vector<16x32xf32>
    %cst_10 = arith.constant dense<0.000000e+00> : vector<16x1xf32>
    %11 = tpu.matmul %10, %0, %cst_10 {dimension_numbers = #tpu.dot_dimension_numbers<[1], [0], [0], [1], [0, 0, 1, 1], [], []>} : vector<16x32xf32>, vector<32x1xf32>, vector<16x1xf32> -> vector<16x1xf32>
    %12 = vector.broadcast %1 : f32 to vector<16x1xf32>
    %13 = arith.addf %11, %12 : vector<16x1xf32>
    %14 = arith.maximumf %5, %9 : vector<16x1xf32>
    %15 = arith.maximumf %14, %13 : vector<16x1xf32>
    %16 = arith.subf %5, %15 : vector<16x1xf32>
    %17 = math.exp %16 : vector<16x1xf32>
    %18 = arith.subf %9, %15 : vector<16x1xf32>
    %19 = math.exp %18 : vector<16x1xf32>
    %20 = arith.subf %13, %15 : vector<16x1xf32>
    %21 = math.exp %20 : vector<16x1xf32>
    %22 = arith.addf %17, %19 : vector<16x1xf32>
    %23 = arith.addf %22, %21 : vector<16x1xf32>
    %c0_11 = arith.constant 0 : index
    %c0_12 = arith.constant 0 : index
    %24 = vector.load %arg1[%c0_11, %c0_12] : memref<16x32xf32, #tpu.memory_space<vmem>>, vector<16x32xf32>
    %25 = vector.broadcast %17 : vector<16x1xf32> to vector<16x32xf32>
    %26 = arith.mulf %24, %25 : vector<16x32xf32>
    %c0_13 = arith.constant 0 : index
    %c0_14 = arith.constant 0 : index
    %27 = vector.load %arg2[%c0_13, %c0_14] : memref<16x32xf32, #tpu.memory_space<vmem>>, vector<16x32xf32>
    %28 = vector.broadcast %19 : vector<16x1xf32> to vector<16x32xf32>
    %29 = arith.mulf %27, %28 : vector<16x32xf32>
    %30 = arith.addf %26, %29 : vector<16x32xf32>
    %c0_15 = arith.constant 0 : index
    %c0_16 = arith.constant 0 : index
    %31 = vector.load %arg3[%c0_15, %c0_16] : memref<16x32xf32, #tpu.memory_space<vmem>>, vector<16x32xf32>
    %32 = vector.broadcast %21 : vector<16x1xf32> to vector<16x32xf32>
    %33 = arith.mulf %31, %32 : vector<16x32xf32>
    %34 = arith.addf %30, %33 : vector<16x32xf32>
    %35 = vector.broadcast %23 : vector<16x1xf32> to vector<16x32xf32>
    %36 = arith.divf %34, %35 : vector<16x32xf32>
    %cst_17 = arith.constant 0.000000e+00 : f32
    %37 = vector.broadcast %cst_17 : f32 to vector<16x32xf32>
    %38 = arith.maximumf %36, %37 : vector<16x32xf32>
    %c0_18 = arith.constant 0 : index
    %c0_19 = arith.constant 0 : index
    %39 = vector.load %arg6[%c0_18, %c0_19] : memref<16x32xf32, #tpu.memory_space<vmem>>, vector<16x32xf32>
    tpu.vector_store %arg6[%c0_18, %c0_19], %38 {strides = array<i32>} : memref<16x32xf32, #tpu.memory_space<vmem>>, vector<16x32xf32>,
    return
  }
  func.func @transform_0(%arg0: i32) -> (i32, i32) {
    %c0_i32 = arith.constant 0 : i32
    %c0_i32_0 = arith.constant 0 : i32
    return %arg0, %c0_i32 : i32, i32
  }
  func.func @transform_1(%arg0: i32) -> (i32, i32) {
    %c0_i32 = arith.constant 0 : i32
    %c0_i32_0 = arith.constant 0 : i32
    return %arg0, %c0_i32 : i32, i32
  }
  func.func @transform_2(%arg0: i32) -> (i32, i32) {
    %c0_i32 = arith.constant 0 : i32
    %c0_i32_0 = arith.constant 0 : i32
    return %arg0, %c0_i32 : i32, i32
  }
  func.func @transform_3(%arg0: i32) -> (i32, i32) {
    %c0_i32 = arith.constant 0 : i32
    %c0_i32_0 = arith.constant 0 : i32
    %c0_i32_1 = arith.constant 0 : i32
    return %c0_i32, %c0_i32_0 : i32, i32
  }
  func.func @transform_4(%arg0: i32) -> (i32, i32) {
    %c0_i32 = arith.constant 0 : i32
    %c0_i32_0 = arith.constant 0 : i32
    %c0_i32_1 = arith.constant 0 : i32
    return %c0_i32, %c0_i32_0 : i32, i32
  }
  func.func @transform_5(%arg0: i32) -> (i32, i32) {
    %c0_i32 = arith.constant 0 : i32
    %c0_i32_0 = arith.constant 0 : i32
    return %arg0, %c0_i32 : i32, i32
  }
}

</mosaic_0001>

<bundles_post_ra>
// kernel: tpu_custom_call.1
= control target key start
LH: loop header
LB: loop body
LE: loop exit
PB: predicated region body
PF: predicated region fallthrough
CT: control target
= control target key end

     0   :  { %11 = vsyncpa [#allocation4], 0  ;;  %s623_s0 = inlined_call_operand.vmem [shape: f32[16,32], index: 0, kind: input, shape index: {}]   ;;  %s624_s1 = inlined_call_operand.vmem [shape: f32[16,32], index: 1, kind: input, shape index: {}]   ;;  %s625_s2 = inlined_call_operand.hbm [shape: f32[16,32], index: 2, kind: input, shape index: {}]   ;;  %s626_s3 = inlined_call_operand.vmem [shape: f32[32,1], index: 3, kind: input, shape index: {}]   ;;  %s627_s4 = inlined_call_operand.<no memory space> [shape: f32[1,1], index: 4, kind: input, shape index: {}]   ;;  %s628_s5 = inlined_call_operand.hbm [shape: f32[16,32], index: 5, kind: output, shape index: {}]  }
   0x1   :  { %12 = vsyncpa [#allocation5], 0  ;;  %s517_s18 = smov [#allocation3]  }
   0x2   :  { %s22_s19 = sshll.u32 %s517_s18, 4  ;;  %s23_s19 = int_to_ptr.vmem [resolvable:$true] %s22_s19 }
   0x3   :  { %s481_s20 = scalar_lea.vmem %s23_s19, 256  ;;  %p486_p1 = scmp.lt.s32.totalorder %s23_s19, %s23_s19 }
   0x4   :  { %p482_p0 = scmp.ne.s32.totalorder %s23_s19, %s481_s20  ;;  %p487_p2 = scmp.lt.s32.totalorder %s481_s20, %s481_s20 }
   0x6   :  { %p488_p3 = por %p487_p2, %p486_p1 }
   0x8   :  { %p489_p4 = pnand %p488_p3, %p482_p0 }
   0xa   :  { %492 = shalt.err (!%p489_p4)
}
   0xb   :  { %s518_s21 = smov 128   ;;  %s519_s22 = smov 8  }
   0xc   :  { %28 = dma.hbm_to_vmem [thread:$0]  %s625_s2, 256, %s23_s19, [#allocation4], %s518_s21, %s518_s21, %s519_s22  }
   0xd   :  { %513 = dma.done.wait [#allocation4], 256  }
   0xe   :  { %514 = vsyncadd [#allocation4], 4294967040  ;;  %v39_v0 = vld [vmem:[%s626_s3 + $0x18] sm:$0xff]  ;;  %v38_v1 = vld [vmem:[%s626_s3 + $0x10] sm:$0xff]  ;;  %vm44_vm0 = vcmask 261120   ;;  %v520_v10 = vmov 0   ;;  %v43_v13 = vstv %s627_s4 }
   0xf   :  { %417 = vmatprep.subr.mxu0 %v39_v0  ;;  %428 = vmatprep.subr.mxu1 %v39_v0  ;;  %v37_v2 = vld [vmem:[%s626_s3 + $0x8] sm:$0xff]  ;;  %v36_v3 = vld [vmem:[%s626_s3] sm:$0xff]  ;;  %s521_s4 = smov [#allocation6]  }
  0x10   :  { %418 = vmatpush3.msra.mxu0 %v39_v0  ;;  %429 = vmatpush3.msra.mxu1 %v39_v0  ;;  %v573_v4 = vld [vmem:[%s623_s0] sm:$0xff]  ;;  %v583_v6 = vld [vmem:[%s623_s0 + $0x8] sm:$0xff]  ;;  %s381_s14 = sshll.u32 %s521_s4, 4  ;;  %s382_s14 = int_to_ptr.vmem [resolvable:$true] %s381_s14 }
  0x11   :  { %419 = vmatprep.subr.mxu0 %v38_v1  ;;  %430 = vmatprep.subr.mxu1 %v38_v1  ;;  %v578_v5 = vld [vmem:[%s624_s1] sm:$0xff]  ;;  %v588_v7 = vld [vmem:[%s624_s1 + $0x8] sm:$0xff]  ;;  %s493_s15 = scalar_lea.vmem %s382_s14, 256  ;;  %p498_p6 = scmp.lt.s32.totalorder %s382_s14, %s382_s14 }
  0x12   :  { %420 = vmatpush3.msra.mxu0 %v38_v1  ;;  %431 = vmatpush3.msra.mxu1 %v38_v1  ;;  %v592_v8 = vld [vmem:[#allocation3] sm:$0xff]  ;;  %v602_v9 = vld [vmem:[#allocation3 + $0x8] sm:$0xff]  ;;  %p494_p5 = scmp.ne.s32.totalorder %s382_s14, %s493_s15  ;;  %p499_p7 = scmp.lt.s32.totalorder %s493_s15, %s493_s15 }
  0x13   :  { %421 = vmatprep.subr.mxu0 %v37_v2  ;;  %432 = vmatprep.subr.mxu1 %v37_v2 }
  0x14   :  { %422 = vmatpush3.msra.mxu0 %v37_v2  ;;  %433 = vmatpush3.msra.mxu1 %v37_v2  ;;  %p500_p8 = por %p499_p7, %p498_p6 }
  0x15   :  { %423 = vmatprep.subr.mxu0 %v36_v3  ;;  %434 = vmatprep.subr.mxu1 %v36_v3 }
  0x16   :  { %424 = vmatpush3.msra.mxu0 %v36_v3  ;;  %425 = vmatprep.mubr.msk.f32.mxu0 %vm44_vm0, %v573_v4  ;;  %p501_p9 = pnand %p500_p8, %p494_p5 }
  0x17   :  { %435 = vmatpush3.msra.mxu1 %v36_v3  ;;  %436 = vmatprep.mubr.msk.f32.mxu1 %vm44_vm0, %v578_v5 }
  0x18   :  { %426 = vmatmul.mubr.msk.f32.vlgmr.msra.gmra.mxu0 %vm44_vm0, %v583_v6  ;;  %437 = vmatmul.mubr.msk.f32.vlgmr.msra.gmra.mxu1 %vm44_vm0, %v588_v7 }
  0x19   :  { %439 = vmatprep.subr.mxu0 %v39_v0  ;;  %447 = vmatprep.mubr.msk.f32.mxu0 %vm44_vm0, %v592_v8 }
  0x1a   :  { %440 = vmatpush3.msra.mxu0 %v39_v0  ;;  %456 = vset.pattern.permute.xlu1 %v520_v10 }
  0x1b   :  { %441 = vmatprep.subr.mxu0 %v38_v1  ;;  %455 = vset.pattern.permute.xlu0 %v520_v10 }
  0x1c   :  { %442 = vmatpush3.msra.mxu0 %v38_v1 }
  0x1d   :  { %443 = vmatprep.subr.mxu0 %v37_v2 }
  0x1e   :  { %444 = vmatpush3.msra.mxu0 %v37_v2 }
  0x1f   :  { %445 = vmatprep.subr.mxu0 %v36_v3 }
  0x20   :  { %446 = vmatpush3.msra.mxu0 %v36_v3 }
  0x21   :  { %448 = vmatmul.mubr.msk.f32.vlgmr.msra.gmra.mxu0 %vm44_vm0, %v602_v9 }
  0xd8   :  { %v427_v11 = vpop.f32.mrf.mxu0  ;;  %v438_v12 = vpop.f32.mrf.mxu1 }
  0xd9   :  { %v123_v16 = vadd.f32 %v427_v11, %v43_v13  ;;  %v206_v17 = vadd.f32 %v438_v12, %v43_v13 }
  0xda   :  { %v117_v14 = vpop.f32.mrf.mxu0  ;;  %v200_v15 = vpop.f32.mrf.mxu1 }
  0xdb   :  { %v118_v18 = vadd.f32 %v117_v14, %v43_v13  ;;  %v201_v19 = vadd.f32 %v200_v15, %v43_v13  ;;  %v293_v21 = vmax.f32 %v123_v16, %v206_v17 }
  0xdd   :  { %v292_v24 = vmax.f32 %v118_v18, %v201_v19 }
  0xe1   :  { %v449_v20 = vpop.f32.mrf.mxu0 }
  0xe2   :  { %v289_v22 = vadd.f32 %v449_v20, %v43_v13 }
  0xe3   :  { %v283_v23 = vpop.f32.mrf.mxu0 }
  0xe4   :  { %v295_v25 = vmax.f32 %v293_v21, %v289_v22  ;;  %v284_v26 = vadd.f32 %v283_v23, %v43_v13 }
  0xe6   :  { %v297_v27 = vsub.f32 %v123_v16, %v295_v25  ;;  %v303_v28 = vsub.f32 %v206_v17, %v295_v25  ;;  %v294_v29 = vmax.f32 %v292_v24, %v284_v26  ;;  %v309_v37 = vsub.f32 %v289_v22, %v295_v25 }
  0xe8   :  { %v300_v30 = vmul.f32 1.442695, %v297_v27  ;;  %v306_v31 = vmul.f32 1.442695, %v303_v28  ;;  %v296_v32 = vsub.f32 %v118_v18, %v294_v29  ;;  %v302_v33 = vsub.f32 %v201_v19, %v294_v29 }
  0xe9   :  { %v308_v34 = vsub.f32 %v284_v26, %v294_v29  ;;  %v312_v39 = vmul.f32 1.442695, %v309_v37 }
  0xea   :  { %v298_v35 = vmul.f32 1.442695, %v296_v32  ;;  %457 = vpow2.f32 %v300_v30  ;;  %v304_v36 = vmul.f32 1.442695, %v302_v33 }
  0xeb   :  { %459 = vpow2.f32 %v306_v31  ;;  %v310_v38 = vmul.f32 1.442695, %v308_v34 }
  0xec   :  { %461 = vpow2.f32 %v298_v35 }
  0xed   :  { %463 = vpow2.f32 %v304_v36 }
  0xee   :  { %465 = vpow2.f32 %v310_v38 }
  0xef   :  { %467 = vpow2.f32 %v312_v39 }
  0xf7   :  { %v458_v40 = vpop.eup %457 }
  0xf8   :  { %v460_v41 = vpop.eup %459 }
  0xf9   :  { %v462_v42 = vpop.eup %461  ;;  %v315_v47 = vadd.f32 %v460_v41, %v458_v40 }
  0xfa   :  { %v464_v43 = vpop.eup %463  ;;  %320 = vperm.xlu1 %456, %v462_v42  }
  0xfb   :  { %v314_v44 = vadd.f32 %v464_v43, %v462_v42  ;;  %v466_v45 = vpop.eup %465 }
  0xfc   :  { %v468_v48 = vpop.eup %467 }
  0xfd   :  { %v316_v46 = vadd.f32 %v466_v45, %v314_v44  ;;  %v317_v49 = vadd.f32 %v468_v48, %v315_v47 }
  0xfe   :  { %325 = vperm.xlu1 %456, %v458_v40  }
  0xff   :  { %360 = vperm.xlu0 %455, %v316_v46  }
 0x102   :  { %337 = vperm.xlu1 %456, %v460_v41  }
 0x103   :  { %365 = vperm.xlu0 %455, %v317_v49  }
 0x106   :  { %351 = vperm.xlu1 %456, %v468_v48  }
 0x107   :  { %332 = vperm.xlu0 %455, %v464_v43  }
 0x10b   :  { %346 = vperm.xlu0 %455, %v466_v45  }
 0x175   :  { %v321_v50 = vpop.permute.xlu1 %320 }
 0x176   :  { %v328_v58 = vmul.f32 %v321_v50, %v573_v4 }
 0x179   :  { %v326_v51 = vpop.permute.xlu1 %325 }
 0x17a   :  { %v361_v52 = vpop.permute.xlu0 %360  ;;  %v329_v61 = vmul.f32 %v326_v51, %v583_v6 }
 0x17b   :  { %469 = vrcp.f32 %v361_v52 }
 0x17d   :  { %v338_v53 = vpop.permute.xlu1 %337 }
 0x17e   :  { %v366_v54 = vpop.permute.xlu0 %365  ;;  %v341_v59 = vmul.f32 %v338_v53, %v588_v7 }
 0x17f   :  { %471 = vrcp.f32 %v366_v54 }
 0x180   :  { %v343_v1 = vadd.f32 %v341_v59, %v329_v61 }
 0x181   :  { %v352_v57 = vpop.permute.xlu1 %351 }
 0x182   :  { %v333_v55 = vpop.permute.xlu0 %332  ;;  %v355_v62 = vmul.f32 %v352_v57, %v602_v9 }
 0x183   :  { %v340_v56 = vmul.f32 %v333_v55, %v578_v5 }
 0x184   :  { %v357_v10 = vadd.f32 %v355_v62, %v343_v1 }
 0x185   :  { %v342_v63 = vadd.f32 %v340_v56, %v328_v58 }
 0x186   :  { %v347_v60 = vpop.permute.xlu0 %346 }
 0x187   :  { %v354_v0 = vmul.f32 %v347_v60, %v592_v8 }
 0x188   :  { %v470_v3 = vpop.eup %469 }
 0x189   :  { %v356_v2 = vadd.f32 %v354_v0, %v342_v63 }
 0x18b   :  { %v369_v11 = vmul.f32 %v470_v3, %v356_v2 }
 0x18c   :  { %v472_v12 = vpop.eup %471 }
 0x18d   :  { %v371_v5 = vmul.f32 %v472_v12, %v357_v10  ;;  %v372_v4 = vmax.f32 %v369_v11, 0.0 }
 0x18f   :  { %v373_v13 = vmax.f32 %v371_v5, 0.0  ;;  %374 = vst.msk [vmem:[#allocation6] sm:$0xff] %vm44_vm0, %v372_v4 }
 0x191   :  { %375 = vst.msk [vmem:[#allocation6 + $0x8] sm:$0xff] %vm44_vm0, %v373_v13 }
 0x192   :  { %504 = shalt.err (!%p501_p9)
}
 0x193   :  { %387 = dma.vmem_to_hbm [thread:$0]  %s382_s14, 256, %s628_s5, [#allocation5], %s518_s21, %s518_s21, %s519_s22  }
 0x194   :  { %515 = dma.done.wait [#allocation5], 256  }
 0x195   :  { %516 = vsyncadd [#allocation5], 4294967040 }
 0x196   :  { %391 = vsyncpa [#allocation4], 1 }
 0x197   :  { %392 = vsyncpa [#allocation5], 1 }

</bundles_post_ra>
